<compile_context>
chip_gen: v5e
topology: v5e:2x2
jax: 0.10.0
libtpu: 0.0.40
codegen_flags: <defaults>
</compile_context>

<pallas_src>
import math

import jax
import jax.numpy as jnp
from jax.experimental import pallas as pl
from jax.experimental.pallas import tpu as pltpu


# ---------------------------------------------------------------------------
# helpers
# ---------------------------------------------------------------------------
def _round_up(x, m):
    return (x + m - 1) // m * m


def _cdiv(a, b):
    return (a + b - 1) // b


def _choose_f_tiling(f, cap, min_splits=1):
    """Balanced lane tiling: tile_f multiple of 128, n_tiles multiple of
    min_splits, tile_f <= cap (unless F itself is smaller), minimal padding."""
    f128 = _round_up(max(f, 1), 128)
    n_tiles = max(_cdiv(f128, cap), 1)
    n_tiles = _round_up(n_tiles, min_splits)
    tile_f = _round_up(_cdiv(f128, n_tiles), 128)
    return tile_f, n_tiles


def _pad2d(x, rows, cols):
    pr, pc = rows - x.shape[0], cols - x.shape[1]
    if pr == 0 and pc == 0:
        return x
    return jnp.pad(x, ((0, pr), (0, pc)))


def _vmem_limit(need_bytes):
    # explicit scoped-VMEM limit: enough for the tiles (+headroom), clamped so
    # it is valid on v5e/v6e (128 MiB phys) and v7x (64 MiB phys).
    return int(min(max(need_bytes + (8 << 20), 32 << 20), 48 << 20))


def _buffered_spec(block_shape, index_map, buffers):
    """BlockSpec with N-deep pipelining when supported by the jax version."""
    try:
        return pl.BlockSpec(block_shape, index_map,
                            pipeline_mode=pl.Buffered(buffers))
    except TypeError:
        return pl.BlockSpec(block_shape, index_map)


# ---------------------------------------------------------------------------
# Kernel 1: per-sample convex combination with scalar-per-row alpha broadcast.
# Streamed over a 2-D grid of (TILE_N, TILE_F) lane-dense tiles.
# ---------------------------------------------------------------------------
def _interp_kernel(alpha_ref, xt_ref, xg_ref, out_ref):
    a = alpha_ref[...].astype(jnp.float32)                 # (TILE_N, 1)
    xt = xt_ref[...].astype(jnp.float32)
    xg = xg_ref[...].astype(jnp.float32)
    out_ref[...] = (a * xt + (1.0 - a) * xg).astype(out_ref.dtype)


def interpolate(alpha_col, xt_flat, xg_flat, *, tile_n, tile_f):
    n_pad, f_pad = xt_flat.shape
    grid = (n_pad // tile_n, f_pad // tile_f)
    nbytes = xt_flat.dtype.itemsize
    need = 2 * 3 * tile_n * tile_f * nbytes + 2 * tile_n * nbytes
    cost = pl.CostEstimate(
        flops=3 * n_pad * f_pad,
        transcendentals=0,
        bytes_accessed=3 * n_pad * f_pad * nbytes + n_pad * nbytes,
    )
    return pl.pallas_call(
        _interp_kernel,
        out_shape=jax.ShapeDtypeStruct((n_pad, f_pad), xt_flat.dtype),
        grid=grid,
        in_specs=[
            pl.BlockSpec((tile_n, 1), lambda i, j: (i, 0)),
            pl.BlockSpec((tile_n, tile_f), lambda i, j: (i, j)),
            pl.BlockSpec((tile_n, tile_f), lambda i, j: (i, j)),
        ],
        out_specs=pl.BlockSpec((tile_n, tile_f), lambda i, j: (i, j)),
        compiler_params=pltpu.CompilerParams(
            dimension_semantics=("parallel", "parallel"),
            vmem_limit_bytes=_vmem_limit(need)),
        cost_estimate=cost,
    )(alpha_col, xt_flat, xg_flat)


# ---------------------------------------------------------------------------
# Kernel 2: gradient-penalty row reduction (sum of squares per row).
#   grid = (n_splits, row_tiles, k_steps); F reduction axis last.
#   Lane-dense (TILE_N, 128) f32 accumulator: each step folds the squared
#   tile into 128-lane partial sums with static, tile-aligned VPU adds (no
#   per-step cross-lane XLU reduce).  Output block is a lane-dense
#   (TILE_N, 128) slab per F split; the tiny final combine happens outside.
# ---------------------------------------------------------------------------
def _penalty_kernel(g_ref, out_ref, acc_ref):
    k = pl.program_id(2)

    @pl.when(k == 0)
    def _():
        acc_ref[...] = jnp.zeros_like(acc_ref)

    g = g_ref[...].astype(jnp.float32)                     # (TILE_N, TILE_F)
    gg = g * g
    tf = gg.shape[-1]
    partial = gg[:, 0:128]
    for off in range(128, tf, 128):                        # static lane-block fold
        partial = partial + gg[:, off:off + 128]
    acc_ref[...] += partial

    @pl.when(k == pl.num_programs(2) - 1)
    def _():
        out_ref[...] = acc_ref[...]


def penalty_lane_sums(grads_flat, *, tile_n, tile_f, n_splits):
    n_pad, f_pad = grads_flat.shape
    n_tiles = f_pad // tile_f
    assert n_tiles % n_splits == 0
    k_steps = n_tiles // n_splits
    grid = (n_splits, n_pad // tile_n, k_steps)
    nbytes = grads_flat.dtype.itemsize
    need = 3 * tile_n * tile_f * nbytes + 3 * tile_n * 128 * 4
    cost = pl.CostEstimate(
        flops=2 * n_pad * f_pad,
        transcendentals=0,
        bytes_accessed=n_pad * f_pad * nbytes + n_pad * n_splits * 128 * 4,
    )
    return pl.pallas_call(
        _penalty_kernel,
        out_shape=jax.ShapeDtypeStruct((n_pad, n_splits * 128), jnp.float32),
        grid=grid,
        in_specs=[_buffered_spec(
            (tile_n, tile_f),
            lambda s, i, k: (i, s * k_steps + k),
            buffers=3)],
        out_specs=pl.BlockSpec((tile_n, 128), lambda s, i, k: (i, s)),
        scratch_shapes=[pltpu.VMEM((tile_n, 128), jnp.float32)],
        compiler_params=pltpu.CompilerParams(
            dimension_semantics=("parallel", "parallel", "arbitrary"),
            vmem_limit_bytes=_vmem_limit(need)),
        cost_estimate=cost,
    )(grads_flat)


# ---------------------------------------------------------------------------
# get_penalty glue (mirrors Discriminator.get_penalty).
# ---------------------------------------------------------------------------
def get_penalty(forward_fn, x_true, x_gen, key):
    # x_true.view_as(x_gen)
    x_true = x_true.reshape(x_gen.shape)
    n = x_true.shape[0]
    f = math.prod(x_true.shape[1:])

    # alpha ~ U[0,1) with shape (N, 1, ..., 1)  (torch.rand equivalent)
    alpha = jax.random.uniform(
        key, (n,) + (1,) * (x_true.ndim - 1), dtype=x_true.dtype)

    xt = x_true.reshape(n, f)
    xg = x_gen.reshape(n, f)
    a = alpha.reshape(n, 1)

    # ---- row (sublane) tiling ----------------------------------------------
    sub = 8 if x_true.dtype.itemsize >= 4 else 16
    tile_n = min(_round_up(n, sub), 128)
    n_pad = _round_up(n, tile_n)

    # ---- kernel 1: interpolation (lane cap 8192, balanced padding) ---------
    tile_f_i, n_tiles_i = _choose_f_tiling(f, 8192)
    f_pad_i = tile_f_i * n_tiles_i
    xt_p = _pad2d(xt, n_pad, f_pad_i)
    xg_p = _pad2d(xg, n_pad, f_pad_i)
    a_p = _pad2d(a, n_pad, 1)
    xp_p = interpolate(a_p, xt_p, xg_p, tile_n=tile_n, tile_f=tile_f_i)
    x_penalty = xp_p[:n, :f].reshape(x_gen.shape)

    # torch.autograd.grad(p_penalty, x_penalty, grad_outputs=ones) ==
    # grad of sum(forward(x_penalty)) w.r.t. x_penalty.
    grads = jax.grad(lambda xp: jnp.sum(forward_fn(xp)))(x_penalty)

    # ---- kernel 2: per-row sum of squares (lane cap 16384, 2-way F split) --
    n_splits = 2 if _round_up(f, 128) >= 4096 else 1
    tile_f_r, n_tiles_r = _choose_f_tiling(f, 16384, min_splits=n_splits)
    f_pad_r = tile_f_r * n_tiles_r
    g_p = _pad2d(grads.reshape(n, f), n_pad, f_pad_r)
    lane_sums = penalty_lane_sums(
        g_p, tile_n=tile_n, tile_f=tile_f_r, n_splits=n_splits)

    # tiny final combine over lanes / splits, then (||g||-1)^2 batch mean over
    # the *true* N, so zero-padded rows/cols never bias the result.
    row_sq = jnp.sum(lane_sums[:n], axis=1)                # (n,)
    return jnp.mean((jnp.sqrt(row_sq) - 1.0) ** 2)


# ---------------------------------------------------------------------------
# demo / self-check
# ---------------------------------------------------------------------------
def _reference_penalty(forward_fn, x_true, x_gen, key):
    n = x_true.shape[0]
    alpha = jax.random.uniform(
        key, (n,) + (1,) * (x_true.ndim - 1), dtype=x_true.dtype)
    xp = alpha * x_true + (1.0 - alpha) * x_gen
    g = jax.grad(lambda z: jnp.sum(forward_fn(z)))(xp)
    return jnp.mean(
        (jnp.linalg.norm(g.reshape(n, -1), axis=1) - 1.0) ** 2)


if __name__ == "__main__":
    # TODO(synk): Discriminator.forward is abstract in the reference module
    # (raises NotImplementedError); a deterministic linear stand-in is used
    # here only so the gradient-penalty pipeline has gradients to reduce.
    key = jax.random.PRNGKey(0)

    # case 1: (8,128)-friendly feature size
    N1, C1, H1, W1 = 2, 4, 16, 16
    F1 = C1 * H1 * W1
    k_true, k_gen, k_alpha, k_w, key = jax.random.split(key, 5)
    x_true1 = jax.random.normal(k_true, (N1, C1, H1, W1), dtype=jnp.float32)
    x_gen1 = jax.random.normal(k_gen, (N1, C1, H1, W1), dtype=jnp.float32)
    w1 = jax.random.normal(k_w, (F1,), dtype=jnp.float32) * 0.02
    fwd1 = lambda x: x.reshape(x.shape[0], -1) @ w1

    pen1 = jax.block_until_ready(get_penalty(fwd1, x_true1, x_gen1, k_alpha))
    ref1 = _reference_penalty(fwd1, x_true1, x_gen1, k_alpha)
    assert jnp.allclose(pen1, ref1, rtol=1e-5, atol=1e-5), (pen1, ref1)

    # case 2: awkward feature size (exercises the balanced-padding path)
    N2, C2, H2, W2 = 3, 1, 28, 28
    F2 = C2 * H2 * W2
    k_true, k_gen, k_alpha, k_w, key = jax.random.split(key, 5)
    x_true2 = jax.random.normal(k_true, (N2, C2, H2, W2), dtype=jnp.float32)
    x_gen2 = jax.random.normal(k_gen, (N2, C2, H2, W2), dtype=jnp.float32)
    w2 = jax.random.normal(k_w, (F2,), dtype=jnp.float32) * 0.02
    fwd2 = lambda x: x.reshape(x.shape[0], -1) @ w2

    pen2 = jax.block_until_ready(get_penalty(fwd2, x_true2, x_gen2, k_alpha))
    ref2 = _reference_penalty(fwd2, x_true2, x_gen2, k_alpha)
    assert jnp.allclose(pen2, ref2, rtol=1e-5, atol=1e-5), (pen2, ref2)

    print("KERNEL_OK")
</pallas_src>

<mosaic_0001>
module attributes {stable_mosaic.version = 11 : i64} {
  func.func @_interp_kernel(%arg0: i32, %arg1: i32, %arg2: memref<8x1xf32, #tpu.memory_space<vmem>>, %arg3: memref<8x1024xf32, #tpu.memory_space<vmem>>, %arg4: memref<8x1024xf32, #tpu.memory_space<vmem>>, %arg5: memref<8x1024xf32, #tpu.memory_space<vmem>>) attributes {dimension_semantics = [#tpu.dimension_semantics<parallel>, #tpu.dimension_semantics<parallel>], iteration_bounds = array<i64: 1, 1>, scalar_prefetch = 0 : i64, scratch_operands = 0 : i64, tpu.core_type = #tpu.core_type<tc>, window_params = [{transform_indices = @transform_0, window_bounds = array<i64: 8, 1>}, {transform_indices = @transform_1, window_bounds = array<i64: 8, 1024>}, {transform_indices = @transform_2, window_bounds = array<i64: 8, 1024>}, {transform_indices = @transform_3, window_bounds = array<i64: 8, 1024>}]} {
    %c0 = arith.constant 0 : index
    %c0_0 = arith.constant 0 : index
    %0 = vector.load %arg2[%c0, %c0_0] : memref<8x1xf32, #tpu.memory_space<vmem>>, vector<8x1xf32>
    %c0_1 = arith.constant 0 : index
    %c0_2 = arith.constant 0 : index
    %1 = vector.load %arg3[%c0_1, %c0_2] : memref<8x1024xf32, #tpu.memory_space<vmem>>, vector<8x1024xf32>
    %c0_3 = arith.constant 0 : index
    %c0_4 = arith.constant 0 : index
    %2 = vector.load %arg4[%c0_3, %c0_4] : memref<8x1024xf32, #tpu.memory_space<vmem>>, vector<8x1024xf32>
    %3 = vector.broadcast %0 : vector<8x1xf32> to vector<8x1024xf32>
    %4 = arith.mulf %3, %1 : vector<8x1024xf32>
    %cst = arith.constant 1.000000e+00 : f32
    %5 = vector.broadcast %cst : f32 to vector<8x1xf32>
    %6 = arith.subf %5, %0 : vector<8x1xf32>
    %7 = vector.broadcast %6 : vector<8x1xf32> to vector<8x1024xf32>
    %8 = arith.mulf %7, %2 : vector<8x1024xf32>
    %9 = arith.addf %4, %8 : vector<8x1024xf32>
    %c0_5 = arith.constant 0 : index
    %c0_6 = arith.constant 0 : index
    %10 = vector.load %arg5[%c0_5, %c0_6] : memref<8x1024xf32, #tpu.memory_space<vmem>>, vector<8x1024xf32>
    tpu.vector_store %arg5[%c0_5, %c0_6], %9 {strides = array<i32>} : memref<8x1024xf32, #tpu.memory_space<vmem>>, vector<8x1024xf32>,
    return
  }
  func.func @transform_0(%arg0: i32, %arg1: i32) -> (i32, i32) {
    %c0_i32 = arith.constant 0 : i32
    %c0_i32_0 = arith.constant 0 : i32
    return %arg0, %c0_i32 : i32, i32
  }
  func.func @transform_1(%arg0: i32, %arg1: i32) -> (i32, i32) {
    %c0_i32 = arith.constant 0 : i32
    return %arg0, %arg1 : i32, i32
  }
  func.func @transform_2(%arg0: i32, %arg1: i32) -> (i32, i32) {
    %c0_i32 = arith.constant 0 : i32
    return %arg0, %arg1 : i32, i32
  }
  func.func @transform_3(%arg0: i32, %arg1: i32) -> (i32, i32) {
    %c0_i32 = arith.constant 0 : i32
    return %arg0, %arg1 : i32, i32
  }
}

</mosaic_0001>

<bundles_post_ra>
// kernel: tpu_custom_call.1
= control target key start
LH: loop header
LB: loop body
LE: loop exit
PB: predicated region body
PF: predicated region fallthrough
CT: control target
= control target key end

     0   :  { %8 = vsyncpa [#allocation3], 0  ;;  %s240_s0 = inlined_call_operand.vmem [shape: f32[8,1], index: 0, kind: input, shape index: {}]   ;;  %s241_s1 = inlined_call_operand.hbm [shape: f32[8,1024], index: 1, kind: input, shape index: {}]   ;;  %s242_s2 = inlined_call_operand.hbm [shape: f32[8,1024], index: 2, kind: input, shape index: {}]   ;;  %s243_s3 = inlined_call_operand.hbm [shape: f32[8,1024], index: 3, kind: output, shape index: {}]  }
   0x1   :  { %9 = vsyncpa [#allocation6], 0 }
   0x2   :  { %10 = vsyncpa [#allocation4], 0  ;;  %s18_s14 = sshll.u32 %s241_s1, 4  ;;  %s204_s15 = smov [#allocation2]   ;;  %s19_s14 = int_to_ptr.hbm [resolvable:$true] %s18_s14 }
   0x3   :  { %s20_s16 = sshll.u32 %s204_s15, 4  ;;  %s29_s19 = sshll.u32 %s242_s2, 4  ;;  %s21_s16 = int_to_ptr.vmem [resolvable:$true] %s20_s16  ;;  %s30_s19 = int_to_ptr.hbm [resolvable:$true] %s29_s19 }
   0x4   :  { %23 = dma.hbm_to_vmem [thread:$0]  %s19_s14, 1024, %s21_s16, [#allocation3]  }
   0x5   :  { %s205_s20 = smov [#allocation5]  }
   0x6   :  { %s31_s21 = sshll.u32 %s205_s20, 4  ;;  %s32_s21 = int_to_ptr.vmem [resolvable:$true] %s31_s21 }
   0x7   :  { %34 = dma.hbm_to_vmem [thread:$0]  %s30_s19, 1024, %s32_s21, [#allocation6]  }
   0x8   :  { %198 = dma.done.wait [#allocation3], 1024  }
   0x9   :  { %199 = vsyncadd [#allocation3], 4294966272 }
   0xa   :  { %200 = dma.done.wait [#allocation6], 1024  }
   0xb   :  { %201 = vsyncadd [#allocation6], 4294966272  ;;  %v206_v0 = vmov 0   ;;  %v43_v1 = vld [vmem:[%s240_s0] sm:$0xff]  ;;  %v45_v5 = vld [vmem:[#allocation2 + $0x8] sm:$0xff]  ;;  %s207_s0 = smov [#allocation7]  }
   0xc   :  { %125 = vset.pattern.permute.xlu0 %v206_v0  ;;  %v73_v2 = vsub.f32 1.0, %v43_v1  ;;  %v44_v4 = vld [vmem:[#allocation2] sm:$0xff]  ;;  %v46_v6 = vld [vmem:[#allocation2 + $0x10] sm:$0xff]  ;;  %v47_v7 = vld [vmem:[#allocation2 + $0x18] sm:$0xff]  ;;  %s108_s2 = sshll.u32 %s207_s0, 4  ;;  %s110_s25 = sshll.u32 %s243_s3, 4  ;;  %s109_s2 = int_to_ptr.vmem [resolvable:$true] %s108_s2  ;;  %s111_s25 = int_to_ptr.hbm [resolvable:$true] %s110_s25 }
   0xd   :  { %62 = vperm.xlu0 %125, %v43_v1   ;;  %v52_v8 = vld [vmem:[#allocation5] sm:$0xff]  ;;  %v53_v9 = vld [vmem:[#allocation5 + $0x8] sm:$0xff]  ;;  %v54_v10 = vld [vmem:[#allocation5 + $0x10] sm:$0xff] }
   0xe   :  { %v55_v11 = vld [vmem:[#allocation5 + $0x18] sm:$0xff]  ;;  %v48_v12 = vld [vmem:[#allocation2 + $0x20] sm:$0xff]  ;;  %v57_v14 = vld [vmem:[#allocation5 + $0x28] sm:$0xff] }
   0xf   :  { %v56_v13 = vld [vmem:[#allocation5 + $0x20] sm:$0xff]  ;;  %v58_v15 = vld [vmem:[#allocation5 + $0x30] sm:$0xff]  ;;  %v49_v20 = vld [vmem:[#allocation2 + $0x28] sm:$0xff] }
  0x10   :  { %v59_v21 = vld [vmem:[#allocation5 + $0x38] sm:$0xff]  ;;  %v50_v26 = vld [vmem:[#allocation2 + $0x30] sm:$0xff] }
  0x11   :  { %v51_v31 = vld [vmem:[#allocation2 + $0x38] sm:$0xff] }
  0x15   :  { %76 = vperm.xlu0 %125, %v73_v2  }
  0x7f   :  { %v63_v3 = vpop.permute.xlu0 %62 }
  0x80   :  { %v65_v16 = vmul.f32 %v63_v3, %v44_v4  ;;  %v66_v17 = vmul.f32 %v63_v3, %v45_v5  ;;  %v67_v18 = vmul.f32 %v63_v3, %v46_v6  ;;  %v68_v27 = vmul.f32 %v63_v3, %v47_v7 }
  0x81   :  { %v69_v28 = vmul.f32 %v63_v3, %v48_v12  ;;  %v70_v36 = vmul.f32 %v63_v3, %v49_v20  ;;  %v71_v39 = vmul.f32 %v63_v3, %v50_v26  ;;  %v72_v41 = vmul.f32 %v63_v3, %v51_v31 }
  0x87   :  { %v77_v19 = vpop.permute.xlu0 %76 }
  0x88   :  { %v79_v22 = vmul.f32 %v77_v19, %v52_v8  ;;  %v80_v23 = vmul.f32 %v77_v19, %v53_v9  ;;  %v81_v24 = vmul.f32 %v77_v19, %v54_v10  ;;  %v82_v25 = vmul.f32 %v77_v19, %v55_v11 }
  0x89   :  { %v83_v29 = vmul.f32 %v77_v19, %v56_v13  ;;  %v84_v30 = vmul.f32 %v77_v19, %v57_v14  ;;  %v85_v32 = vmul.f32 %v77_v19, %v58_v15  ;;  %v86_v37 = vmul.f32 %v77_v19, %v59_v21 }
  0x8a   :  { %v87_v33 = vadd.f32 %v79_v22, %v65_v16  ;;  %v88_v34 = vadd.f32 %v80_v23, %v66_v17  ;;  %v89_v35 = vadd.f32 %v81_v24, %v67_v18  ;;  %v90_v38 = vadd.f32 %v82_v25, %v68_v27 }
  0x8b   :  { %v91_v40 = vadd.f32 %v83_v29, %v69_v28  ;;  %v92_v42 = vadd.f32 %v84_v30, %v70_v36  ;;  %v93_v43 = vadd.f32 %v85_v32, %v71_v39  ;;  %v94_v44 = vadd.f32 %v86_v37, %v72_v41 }
  0x8c   :  { %95 = vst [vmem:[#allocation7] sm:$0xff] %v87_v33 }
  0x8d   :  { %96 = vst [vmem:[#allocation7 + $0x8] sm:$0xff] %v88_v34 }
  0x8e   :  { %97 = vst [vmem:[#allocation7 + $0x10] sm:$0xff] %v89_v35 }
  0x8f   :  { %98 = vst [vmem:[#allocation7 + $0x18] sm:$0xff] %v90_v38 }
  0x90   :  { %99 = vst [vmem:[#allocation7 + $0x20] sm:$0xff] %v91_v40 }
  0x91   :  { %100 = vst [vmem:[#allocation7 + $0x28] sm:$0xff] %v92_v42 }
  0x92   :  { %101 = vst [vmem:[#allocation7 + $0x30] sm:$0xff] %v93_v43 }
  0x93   :  { %102 = vst [vmem:[#allocation7 + $0x38] sm:$0xff] %v94_v44 }
  0x94   :  { %113 = dma.vmem_to_hbm [thread:$0]  %s109_s2, 1024, %s111_s25, [#allocation4]  }
  0x95   :  { %202 = dma.done.wait [#allocation4], 1024  }
  0x96   :  { %203 = vsyncadd [#allocation4], 4294966272 }
  0x97   :  { %118 = vsyncpa [#allocation3], 1 }
  0x98   :  { %119 = vsyncpa [#allocation6], 1 }
  0x99   :  { %120 = vsyncpa [#allocation4], 1 }

</bundles_post_ra>
